<compile_context>
chip_gen: v7x
topology: tpu7x:2x2x1
jax: 0.10.0
libtpu: 0.0.40
codegen_flags: <defaults>
</compile_context>

<pallas_src>
import functools

import jax
import jax.numpy as jnp
from jax.experimental import pallas as pl
from jax.experimental.pallas import tpu as pltpu

EPS = 1e-5          # BatchNorm2d default eps
NEG_SLOPE = 0.01    # LeakyReLU default negative_slope
LANE = 128          # TPU lane width


def _conv_tile(xq_ref, w_ref, *, K, stride, Ho, Wo, Cin, Cpad):
    """Conv output for one image: (Ho*Wo, Cpad) in f32.

    xq_ref: (1, s*s, Hq, Wq, Cin) phase-packed padded input tile (f32 in VMEM)
    w_ref : (K*K, Cin, Cpad)      weights (bf16)

    Patch extraction is done here on contiguous slices (addressing + sublane
    shifts only, no strided loads, no HBM im2col); each tap is a small bf16
    MXU dot accumulated in f32.
    """
    s = stride
    acc = jnp.zeros((Ho * Wo, Cpad), jnp.float32)
    for kh in range(K):
        for kw in range(K):
            a, dh = kh % s, kh // s
            b, dw = kw % s, kw // s
            phase = a * s + b
            xs = xq_ref[0, phase, dh:dh + Ho, dw:dw + Wo, :]       # (Ho, Wo, Cin)
            xs = xs.reshape(Ho * Wo, Cin).astype(jnp.bfloat16)
            acc = acc + jnp.dot(xs, w_ref[kh * K + kw],
                                preferred_element_type=jnp.float32)
    return acc


def _stats_kernel(xq_ref, w_ref, stats_ref, *, K, stride, Ho, Wo, Cin, Cpad):
    """Pass 1: accumulate per-channel sum / sum-of-squares over the batch grid."""
    @pl.when(pl.program_id(0) == 0)
    def _():
        stats_ref[...] = jnp.zeros_like(stats_ref)

    conv = _conv_tile(xq_ref, w_ref, K=K, stride=stride,
                      Ho=Ho, Wo=Wo, Cin=Cin, Cpad=Cpad)
    ssum = jnp.sum(conv, axis=0, keepdims=True)           # (1, Cpad)
    ssq = jnp.sum(conv * conv, axis=0, keepdims=True)      # (1, Cpad)
    stats_ref[...] += jnp.concatenate([ssum, ssq], axis=0)


def _norm_kernel(xq_ref, w_ref, scale_ref, bias_ref, out_ref,
                 *, K, stride, Ho, Wo, Cin, Cpad):
    """Pass 2: recompute conv tile, apply folded BN scale/bias + LeakyReLU."""
    conv = _conv_tile(xq_ref, w_ref, K=K, stride=stride,
                      Ho=Ho, Wo=Wo, Cin=Cin, Cpad=Cpad)
    y = conv * scale_ref[...] + bias_ref[...]
    y = jnp.where(y >= 0, y, NEG_SLOPE * y)
    out_ref[...] = y.reshape(1, Ho, Wo, Cpad).astype(out_ref.dtype)


def conv_block_forward(x_nchw, weight, gamma, beta, *, stride, padding=1):
    """Forward pass of convBlock.

    x_nchw: (N, Cin, H, W) f32    weight: (Cout, Cin, K, K)
    gamma/beta: (Cout,)           returns: (N, Cout, Ho, Wo) f32
    """
    N, Cin, H, W = x_nchw.shape
    Cout, _, K, _ = weight.shape
    s = int(stride)
    Ho = (H + 2 * padding - K) // s + 1
    Wo = (W + 2 * padding - K) // s + 1
    Cpad = ((Cout + LANE - 1) // LANE) * LANE      # lane-dense output channels
    Hq = Ho + (K - 1) // s
    Wq = Wo + (K - 1) // s
    s2 = s * s

    # --- glue (plain JAX, O(input) bytes, no 9x im2col blow-up) -------------
    # NCHW -> NHWC, zero-pad, then space-to-depth so every conv tap becomes a
    # contiguous slice inside the kernel: xq[n, a*s+b, i, j, c] = xp[n, i*s+a, j*s+b, c]
    x = jnp.transpose(x_nchw, (0, 2, 3, 1)).astype(jnp.float32)
    xp = jnp.pad(x, ((0, 0), (padding, padding), (padding, padding), (0, 0)))
    xp = xp[:, :s * Hq, :s * Wq, :]
    eh, ew = s * Hq - xp.shape[1], s * Wq - xp.shape[2]
    if eh > 0 or ew > 0:
        xp = jnp.pad(xp, ((0, 0), (0, max(eh, 0)), (0, max(ew, 0)), (0, 0)))
    xq = xp.reshape(N, Hq, s, Wq, s, Cin).transpose(0, 2, 4, 1, 3, 5)
    xq = xq.reshape(N, s2, Hq, Wq, Cin)

    # weights: (Cout,Cin,K,K) -> (K*K, Cin, Cpad) bf16, zero-padded channels
    w = jnp.transpose(weight, (2, 3, 1, 0)).reshape(K * K, Cin, Cout)
    w = jnp.pad(w, ((0, 0), (0, 0), (0, Cpad - Cout))).astype(jnp.bfloat16)

    kargs = dict(K=K, stride=s, Ho=Ho, Wo=Wo, Cin=Cin, Cpad=Cpad)
    xq_spec = pl.BlockSpec((1, s2, Hq, Wq, Cin), lambda n: (n, 0, 0, 0, 0))
    w_spec = pl.BlockSpec((K * K, Cin, Cpad), lambda n: (0, 0, 0))

    # --- pass 1: streaming per-channel sum / sumsq over the batch grid ------
    stats = pl.pallas_call(
        functools.partial(_stats_kernel, **kargs),
        out_shape=jax.ShapeDtypeStruct((2, Cpad), jnp.float32),
        grid=(N,),
        in_specs=[xq_spec, w_spec],
        out_specs=pl.BlockSpec((2, Cpad), lambda n: (0, 0)),
        compiler_params=pltpu.CompilerParams(
            dimension_semantics=("arbitrary",),          # accumulator over batch
            vmem_limit_bytes=32 * 1024 * 1024),
    )(xq, w)

    # Fold BN (train-mode batch stats, biased variance) into one scale/bias.
    cnt = float(N * Ho * Wo)
    mean = stats[0] / cnt
    var = stats[1] / cnt - mean * mean
    gamma_p = jnp.pad(gamma.astype(jnp.float32), (0, Cpad - Cout))
    beta_p = jnp.pad(beta.astype(jnp.float32), (0, Cpad - Cout))
    scale = (gamma_p * jax.lax.rsqrt(var + EPS)).reshape(1, Cpad)
    bias = (beta_p - mean * scale[0]).reshape(1, Cpad)

    # --- pass 2: conv (recomputed, cheap) + scale/bias + LeakyReLU ----------
    out = pl.pallas_call(
        functools.partial(_norm_kernel, **kargs),
        out_shape=jax.ShapeDtypeStruct((N, Ho, Wo, Cpad), jnp.float32),
        grid=(N,),
        in_specs=[xq_spec, w_spec,
                  pl.BlockSpec((1, Cpad), lambda n: (0, 0)),
                  pl.BlockSpec((1, Cpad), lambda n: (0, 0))],
        out_specs=pl.BlockSpec((1, Ho, Wo, Cpad), lambda n: (n, 0, 0, 0)),
        compiler_params=pltpu.CompilerParams(
            dimension_semantics=("parallel",),
            vmem_limit_bytes=32 * 1024 * 1024),
    )(xq, w, scale, bias)

    # NHWC(Cpad) -> NCHW(Cout) to match the PyTorch module interface.
    return jnp.transpose(out[..., :Cout], (0, 3, 1, 2))


def reference_forward(x, weight, gamma, beta, stride, padding=1):
    """Pure-JAX reference mirroring PyTorch convBlock.forward (train mode)."""
    conv = jax.lax.conv_general_dilated(
        x, weight, window_strides=(stride, stride),
        padding=((padding, padding), (padding, padding)),
        dimension_numbers=('NCHW', 'OIHW', 'NCHW'))
    mean = conv.mean(axis=(0, 2, 3), keepdims=True)
    var = jnp.square(conv - mean).mean(axis=(0, 2, 3), keepdims=True)
    y = (conv - mean) * jax.lax.rsqrt(var + EPS)
    y = y * gamma.reshape(1, -1, 1, 1) + beta.reshape(1, -1, 1, 1)
    return jnp.where(y >= 0, y, NEG_SLOPE * y)


if __name__ == "__main__":
    key = jax.random.PRNGKey(0)
    k1, k2, k3, k4 = jax.random.split(key, 4)

    # Shapes consistent with convBlock(in_channels=4, out_channels=8, stride=2)
    N, Cin, H, W = 2, 4, 16, 16
    Cout, K, stride, padding = 8, 3, 2, 1

    x = jax.random.normal(k1, (N, Cin, H, W), dtype=jnp.float32)
    weight = jax.random.normal(k2, (Cout, Cin, K, K), dtype=jnp.float32) * 0.1
    gamma = 1.0 + 0.1 * jax.random.normal(k3, (Cout,), dtype=jnp.float32)
    beta = 0.1 * jax.random.normal(k4, (Cout,), dtype=jnp.float32)

    out = conv_block_forward(x, weight, gamma, beta, stride=stride, padding=padding)
    out = jax.block_until_ready(out)

    ref = reference_forward(x, weight, gamma, beta, stride, padding)
    assert out.shape == ref.shape == (N, Cout, H // stride, W // stride)
    # bf16 MXU operands (f32 accumulation) -> compare at a bf16-appropriate tolerance
    assert jnp.allclose(out, ref, atol=5e-2, rtol=5e-2), "mismatch vs reference"

    print("KERNEL_OK")
</pallas_src>

<mosaic_0001>
module attributes {stable_mosaic.version = 11 : i64} {
  func.func @_stats_kernel(%arg0: i32, %arg1: memref<1x4x9x9x4xf32, #tpu.memory_space<vmem>>, %arg2: memref<9x4x128xbf16, #tpu.memory_space<vmem>>, %arg3: memref<2x128xf32, #tpu.memory_space<vmem>>) attributes {dimension_semantics = [#tpu.dimension_semantics<arbitrary>], iteration_bounds = array<i64: 2>, scalar_prefetch = 0 : i64, scratch_operands = 0 : i64, tpu.core_type = #tpu.core_type<tc>, window_params = [{transform_indices = @transform_0, window_bounds = array<i64: 1, 4, 9, 9, 4>}, {pipeline_mode = #tpu.pipeline_mode<synchronous>, transform_indices = @transform_1, window_bounds = array<i64: 9, 4, 128>}, {pipeline_mode = #tpu.pipeline_mode<synchronous>, transform_indices = @transform_2, window_bounds = array<i64: 2, 128>}]} {
    %c0_i32 = arith.constant 0 : i32
    %0 = arith.cmpi eq, %arg0, %c0_i32 : i32
    %1 = arith.extui %0 : i1 to i32
    %c0_i32_0 = arith.constant 0 : i32
    %2 = arith.cmpi ne, %1, %c0_i32_0 : i32
    scf.if %2 {
      %cst_79 = arith.constant 0.000000e+00 : f32
      %85 = vector.broadcast %cst_79 : f32 to vector<2x128xf32>
      %c0_80 = arith.constant 0 : index
      %c0_81 = arith.constant 0 : index
      %86 = vector.load %arg3[%c0_80, %c0_81] : memref<2x128xf32, #tpu.memory_space<vmem>>, vector<2x128xf32>
      tpu.vector_store %arg3[%c0_80, %c0_81], %85 {strides = array<i32>} : memref<2x128xf32, #tpu.memory_space<vmem>>, vector<2x128xf32>,
    } else {
    }
    %cst = arith.constant 0.000000e+00 : f32
    %3 = vector.broadcast %cst : f32 to vector<64x128xf32>
    %c0 = arith.constant 0 : index
    %c0_1 = arith.constant 0 : index
    %c0_2 = arith.constant 0 : index
    %c0_3 = arith.constant 0 : index
    %c0_4 = arith.constant 0 : index
    %4 = vector.load %arg1[%c0, %c0_1, %c0_2, %c0_3, %c0_4] : memref<1x4x9x9x4xf32, #tpu.memory_space<vmem>>, vector<1x1x8x8x4xf32>
    %5 = vector.shape_cast %4 : vector<1x1x8x8x4xf32> to vector<8x8x4xf32>
    %6 = vector.shape_cast %5 : vector<8x8x4xf32> to vector<64x4xf32>
    %7 = arith.truncf %6 : vector<64x4xf32> to vector<64x4xbf16>
    %c0_5 = arith.constant 0 : index
    %c0_6 = arith.constant 0 : index
    %c0_7 = arith.constant 0 : index
    %8 = vector.load %arg2[%c0_5, %c0_6, %c0_7] : memref<9x4x128xbf16, #tpu.memory_space<vmem>>, vector<1x4x128xbf16>
    %9 = vector.shape_cast %8 : vector<1x4x128xbf16> to vector<4x128xbf16>
    %cst_8 = arith.constant dense<0.000000e+00> : vector<64x128xf32>
    %10 = tpu.matmul %7, %9, %cst_8 {dimension_numbers = #tpu.dot_dimension_numbers<[1], [0], [0], [1], [0, 0, 1, 1], [], []>} : vector<64x4xbf16>, vector<4x128xbf16>, vector<64x128xf32> -> vector<64x128xf32>
    %11 = arith.addf %3, %10 : vector<64x128xf32>
    %c0_9 = arith.constant 0 : index
    %c1 = arith.constant 1 : index
    %c0_10 = arith.constant 0 : index
    %c0_11 = arith.constant 0 : index
    %c0_12 = arith.constant 0 : index
    %12 = vector.load %arg1[%c0_9, %c1, %c0_10, %c0_11, %c0_12] : memref<1x4x9x9x4xf32, #tpu.memory_space<vmem>>, vector<1x1x8x8x4xf32>
    %13 = vector.shape_cast %12 : vector<1x1x8x8x4xf32> to vector<8x8x4xf32>
    %14 = vector.shape_cast %13 : vector<8x8x4xf32> to vector<64x4xf32>
    %15 = arith.truncf %14 : vector<64x4xf32> to vector<64x4xbf16>
    %c1_13 = arith.constant 1 : index
    %c0_14 = arith.constant 0 : index
    %c0_15 = arith.constant 0 : index
    %16 = vector.load %arg2[%c1_13, %c0_14, %c0_15] : memref<9x4x128xbf16, #tpu.memory_space<vmem>>, vector<1x4x128xbf16>
    %17 = vector.shape_cast %16 : vector<1x4x128xbf16> to vector<4x128xbf16>
    %cst_16 = arith.constant dense<0.000000e+00> : vector<64x128xf32>
    %18 = tpu.matmul %15, %17, %cst_16 {dimension_numbers = #tpu.dot_dimension_numbers<[1], [0], [0], [1], [0, 0, 1, 1], [], []>} : vector<64x4xbf16>, vector<4x128xbf16>, vector<64x128xf32> -> vector<64x128xf32>
    %19 = arith.addf %11, %18 : vector<64x128xf32>
    %c0_17 = arith.constant 0 : index
    %c0_18 = arith.constant 0 : index
    %c0_19 = arith.constant 0 : index
    %c1_20 = arith.constant 1 : index
    %c0_21 = arith.constant 0 : index
    %20 = vector.load %arg1[%c0_17, %c0_18, %c0_19, %c1_20, %c0_21] : memref<1x4x9x9x4xf32, #tpu.memory_space<vmem>>, vector<1x1x8x8x4xf32>
    %21 = vector.shape_cast %20 : vector<1x1x8x8x4xf32> to vector<8x8x4xf32>
    %22 = vector.shape_cast %21 : vector<8x8x4xf32> to vector<64x4xf32>
    %23 = arith.truncf %22 : vector<64x4xf32> to vector<64x4xbf16>
    %c2 = arith.constant 2 : index
    %c0_22 = arith.constant 0 : index
    %c0_23 = arith.constant 0 : index
    %24 = vector.load %arg2[%c2, %c0_22, %c0_23] : memref<9x4x128xbf16, #tpu.memory_space<vmem>>, vector<1x4x128xbf16>
    %25 = vector.shape_cast %24 : vector<1x4x128xbf16> to vector<4x128xbf16>
    %cst_24 = arith.constant dense<0.000000e+00> : vector<64x128xf32>
    %26 = tpu.matmul %23, %25, %cst_24 {dimension_numbers = #tpu.dot_dimension_numbers<[1], [0], [0], [1], [0, 0, 1, 1], [], []>} : vector<64x4xbf16>, vector<4x128xbf16>, vector<64x128xf32> -> vector<64x128xf32>
    %27 = arith.addf %19, %26 : vector<64x128xf32>
    %c0_25 = arith.constant 0 : index
    %c2_26 = arith.constant 2 : index
    %c0_27 = arith.constant 0 : index
    %c0_28 = arith.constant 0 : index
    %c0_29 = arith.constant 0 : index
    %28 = vector.load %arg1[%c0_25, %c2_26, %c0_27, %c0_28, %c0_29] : memref<1x4x9x9x4xf32, #tpu.memory_space<vmem>>, vector<1x1x8x8x4xf32>
    %29 = vector.shape_cast %28 : vector<1x1x8x8x4xf32> to vector<8x8x4xf32>
    %30 = vector.shape_cast %29 : vector<8x8x4xf32> to vector<64x4xf32>
    %31 = arith.truncf %30 : vector<64x4xf32> to vector<64x4xbf16>
    %c3 = arith.constant 3 : index
    %c0_30 = arith.constant 0 : index
    %c0_31 = arith.constant 0 : index
    %32 = vector.load %arg2[%c3, %c0_30, %c0_31] : memref<9x4x128xbf16, #tpu.memory_space<vmem>>, vector<1x4x128xbf16>
    %33 = vector.shape_cast %32 : vector<1x4x128xbf16> to vector<4x128xbf16>
    %cst_32 = arith.constant dense<0.000000e+00> : vector<64x128xf32>
    %34 = tpu.matmul %31, %33, %cst_32 {dimension_numbers = #tpu.dot_dimension_numbers<[1], [0], [0], [1], [0, 0, 1, 1], [], []>} : vector<64x4xbf16>, vector<4x128xbf16>, vector<64x128xf32> -> vector<64x128xf32>
    %35 = arith.addf %27, %34 : vector<64x128xf32>
    %c0_33 = arith.constant 0 : index
    %c3_34 = arith.constant 3 : index
    %c0_35 = arith.constant 0 : index
    %c0_36 = arith.constant 0 : index
    %c0_37 = arith.constant 0 : index
    %36 = vector.load %arg1[%c0_33, %c3_34, %c0_35, %c0_36, %c0_37] : memref<1x4x9x9x4xf32, #tpu.memory_space<vmem>>, vector<1x1x8x8x4xf32>
    %37 = vector.shape_cast %36 : vector<1x1x8x8x4xf32> to vector<8x8x4xf32>
    %38 = vector.shape_cast %37 : vector<8x8x4xf32> to vector<64x4xf32>
    %39 = arith.truncf %38 : vector<64x4xf32> to vector<64x4xbf16>
    %c4 = arith.constant 4 : index
    %c0_38 = arith.constant 0 : index
    %c0_39 = arith.constant 0 : index
    %40 = vector.load %arg2[%c4, %c0_38, %c0_39] : memref<9x4x128xbf16, #tpu.memory_space<vmem>>, vector<1x4x128xbf16>
    %41 = vector.shape_cast %40 : vector<1x4x128xbf16> to vector<4x128xbf16>
    %cst_40 = arith.constant dense<0.000000e+00> : vector<64x128xf32>
    %42 = tpu.matmul %39, %41, %cst_40 {dimension_numbers = #tpu.dot_dimension_numbers<[1], [0], [0], [1], [0, 0, 1, 1], [], []>} : vector<64x4xbf16>, vector<4x128xbf16>, vector<64x128xf32> -> vector<64x128xf32>
    %43 = arith.addf %35, %42 : vector<64x128xf32>
    %c0_41 = arith.constant 0 : index
    %c2_42 = arith.constant 2 : index
    %c0_43 = arith.constant 0 : index
    %c1_44 = arith.constant 1 : index
    %c0_45 = arith.constant 0 : index
    %44 = vector.load %arg1[%c0_41, %c2_42, %c0_43, %c1_44, %c0_45] : memref<1x4x9x9x4xf32, #tpu.memory_space<vmem>>, vector<1x1x8x8x4xf32>
    %45 = vector.shape_cast %44 : vector<1x1x8x8x4xf32> to vector<8x8x4xf32>
    %46 = vector.shape_cast %45 : vector<8x8x4xf32> to vector<64x4xf32>
    %47 = arith.truncf %46 : vector<64x4xf32> to vector<64x4xbf16>
    %c5 = arith.constant 5 : index
    %c0_46 = arith.constant 0 : index
    %c0_47 = arith.constant 0 : index
    %48 = vector.load %arg2[%c5, %c0_46, %c0_47] : memref<9x4x128xbf16, #tpu.memory_space<vmem>>, vector<1x4x128xbf16>
    %49 = vector.shape_cast %48 : vector<1x4x128xbf16> to vector<4x128xbf16>
    %cst_48 = arith.constant dense<0.000000e+00> : vector<64x128xf32>
    %50 = tpu.matmul %47, %49, %cst_48 {dimension_numbers = #tpu.dot_dimension_numbers<[1], [0], [0], [1], [0, 0, 1, 1], [], []>} : vector<64x4xbf16>, vector<4x128xbf16>, vector<64x128xf32> -> vector<64x128xf32>
    %51 = arith.addf %43, %50 : vector<64x128xf32>
    %c0_49 = arith.constant 0 : index
    %c0_50 = arith.constant 0 : index
    %c1_51 = arith.constant 1 : index
    %c0_52 = arith.constant 0 : index
    %c0_53 = arith.constant 0 : index
    %52 = vector.load %arg1[%c0_49, %c0_50, %c1_51, %c0_52, %c0_53] : memref<1x4x9x9x4xf32, #tpu.memory_space<vmem>>, vector<1x1x8x8x4xf32>
    %53 = vector.shape_cast %52 : vector<1x1x8x8x4xf32> to vector<8x8x4xf32>
    %54 = vector.shape_cast %53 : vector<8x8x4xf32> to vector<64x4xf32>
    %55 = arith.truncf %54 : vector<64x4xf32> to vector<64x4xbf16>
    %c6 = arith.constant 6 : index
    %c0_54 = arith.constant 0 : index
    %c0_55 = arith.constant 0 : index
    %56 = vector.load %arg2[%c6, %c0_54, %c0_55] : memref<9x4x128xbf16, #tpu.memory_space<vmem>>, vector<1x4x128xbf16>
    %57 = vector.shape_cast %56 : vector<1x4x128xbf16> to vector<4x128xbf16>
    %cst_56 = arith.constant dense<0.000000e+00> : vector<64x128xf32>
    %58 = tpu.matmul %55, %57, %cst_56 {dimension_numbers = #tpu.dot_dimension_numbers<[1], [0], [0], [1], [0, 0, 1, 1], [], []>} : vector<64x4xbf16>, vector<4x128xbf16>, vector<64x128xf32> -> vector<64x128xf32>
    %59 = arith.addf %51, %58 : vector<64x128xf32>
    %c0_57 = arith.constant 0 : index
    %c1_58 = arith.constant 1 : index
    %c1_59 = arith.constant 1 : index
    %c0_60 = arith.constant 0 : index
    %c0_61 = arith.constant 0 : index
    %60 = vector.load %arg1[%c0_57, %c1_58, %c1_59, %c0_60, %c0_61] : memref<1x4x9x9x4xf32, #tpu.memory_space<vmem>>, vector<1x1x8x8x4xf32>
    %61 = vector.shape_cast %60 : vector<1x1x8x8x4xf32> to vector<8x8x4xf32>
    %62 = vector.shape_cast %61 : vector<8x8x4xf32> to vector<64x4xf32>
    %63 = arith.truncf %62 : vector<64x4xf32> to vector<64x4xbf16>
    %c7 = arith.constant 7 : index
    %c0_62 = arith.constant 0 : index
    %c0_63 = arith.constant 0 : index
    %64 = vector.load %arg2[%c7, %c0_62, %c0_63] : memref<9x4x128xbf16, #tpu.memory_space<vmem>>, vector<1x4x128xbf16>
    %65 = vector.shape_cast %64 : vector<1x4x128xbf16> to vector<4x128xbf16>
    %cst_64 = arith.constant dense<0.000000e+00> : vector<64x128xf32>
    %66 = tpu.matmul %63, %65, %cst_64 {dimension_numbers = #tpu.dot_dimension_numbers<[1], [0], [0], [1], [0, 0, 1, 1], [], []>} : vector<64x4xbf16>, vector<4x128xbf16>, vector<64x128xf32> -> vector<64x128xf32>
    %67 = arith.addf %59, %66 : vector<64x128xf32>
    %c0_65 = arith.constant 0 : index
    %c0_66 = arith.constant 0 : index
    %c1_67 = arith.constant 1 : index
    %c1_68 = arith.constant 1 : index
    %c0_69 = arith.constant 0 : index
    %68 = vector.load %arg1[%c0_65, %c0_66, %c1_67, %c1_68, %c0_69] : memref<1x4x9x9x4xf32, #tpu.memory_space<vmem>>, vector<1x1x8x8x4xf32>
    %69 = vector.shape_cast %68 : vector<1x1x8x8x4xf32> to vector<8x8x4xf32>
    %70 = vector.shape_cast %69 : vector<8x8x4xf32> to vector<64x4xf32>
    %71 = arith.truncf %70 : vector<64x4xf32> to vector<64x4xbf16>
    %c8 = arith.constant 8 : index
    %c0_70 = arith.constant 0 : index
    %c0_71 = arith.constant 0 : index
    %72 = vector.load %arg2[%c8, %c0_70, %c0_71] : memref<9x4x128xbf16, #tpu.memory_space<vmem>>, vector<1x4x128xbf16>
    %73 = vector.shape_cast %72 : vector<1x4x128xbf16> to vector<4x128xbf16>
    %cst_72 = arith.constant dense<0.000000e+00> : vector<64x128xf32>
    %74 = tpu.matmul %71, %73, %cst_72 {dimension_numbers = #tpu.dot_dimension_numbers<[1], [0], [0], [1], [0, 0, 1, 1], [], []>} : vector<64x4xbf16>, vector<4x128xbf16>, vector<64x128xf32> -> vector<64x128xf32>
    %75 = arith.addf %67, %74 : vector<64x128xf32>
    %cst_73 = arith.constant dense<0.000000e+00> : vector<128xf32>
    %76 = vector.multi_reduction <add>, %75, %cst_73 [0] : vector<64x128xf32> to vector<128xf32>
    %77 = vector.shape_cast %76 : vector<128xf32> to vector<1x128xf32>
    %78 = arith.mulf %75, %75 : vector<64x128xf32>
    %cst_74 = arith.constant dense<0.000000e+00> : vector<128xf32>
    %79 = vector.multi_reduction <add>, %78, %cst_74 [0] : vector<64x128xf32> to vector<128xf32>
    %80 = vector.shape_cast %79 : vector<128xf32> to vector<1x128xf32>
    %c0_75 = arith.constant 0 : index
    %c0_76 = arith.constant 0 : index
    %81 = vector.load %arg3[%c0_75, %c0_76] : memref<2x128xf32, #tpu.memory_space<vmem>>, vector<2x128xf32>
    %82 = tpu.concatenate %77, %80 in 0 : vector<1x128xf32>, vector<1x128xf32> -> vector<2x128xf32>
    %83 = arith.addf %81, %82 : vector<2x128xf32>
    %c0_77 = arith.constant 0 : index
    %c0_78 = arith.constant 0 : index
    %84 = vector.load %arg3[%c0_77, %c0_78] : memref<2x128xf32, #tpu.memory_space<vmem>>, vector<2x128xf32>
    tpu.vector_store %arg3[%c0_77, %c0_78], %83 {strides = array<i32>} : memref<2x128xf32, #tpu.memory_space<vmem>>, vector<2x128xf32>,
    return
  }
  func.func @transform_0(%arg0: i32) -> (i32, i32, i32, i32, i32) {
    %c0_i32 = arith.constant 0 : i32
    %c0_i32_0 = arith.constant 0 : i32
    %c0_i32_1 = arith.constant 0 : i32
    %c0_i32_2 = arith.constant 0 : i32
    %c0_i32_3 = arith.constant 0 : i32
    return %arg0, %c0_i32, %c0_i32_0, %c0_i32_1, %c0_i32_2 : i32, i32, i32, i32, i32
  }
  func.func @transform_1(%arg0: i32) -> (i32, i32, i32) {
    %c0_i32 = arith.constant 0 : i32
    %c0_i32_0 = arith.constant 0 : i32
    %c0_i32_1 = arith.constant 0 : i32
    %c0_i32_2 = arith.constant 0 : i32
    return %c0_i32, %c0_i32_0, %c0_i32_1 : i32, i32, i32
  }
  func.func @transform_2(%arg0: i32) -> (i32, i32) {
    %c0_i32 = arith.constant 0 : i32
    %c0_i32_0 = arith.constant 0 : i32
    %c0_i32_1 = arith.constant 0 : i32
    return %c0_i32, %c0_i32_0 : i32, i32
  }
}

</mosaic_0001>

<bundles_post_ra>
// kernel: tpu_custom_call.1
= control target key start
LH: loop header
LB: loop body
LE: loop exit
PB: predicated region body
PF: predicated region fallthrough
CT: control target
= control target key end

     0   :  { %7 = vsyncpa [#allocation3], 0  ;;  %s1522_s9 = smov 0   ;;  %s1740_s0 = inlined_call_operand.vmem [shape: f32[2,4,9,9,4], index: 0, kind: input, shape index: {}]   ;;  %s1741_s1 = inlined_call_operand.vmem [shape: bf16[9,4,128], index: 1, kind: input, shape index: {}]   ;;  %s1742_s2 = inlined_call_operand.hbm [shape: f32[2,128], index: 2, kind: output, shape index: {}]  }
   0x1 LB: > { %s1528_s10 = sadd.s32 4294967295, %s1503_s9   ;;  %p1132_p0 = scmp.ge.s32.totalorder %s1503_s9, 1  ;;  %s1503_s9 = sphi %s1522_s9, %s13_s9  }
   0x2   : > { %p108_p1 = scmp.lt.s32.totalorder %s1503_s9, 3 }
   0x4   : > { %p109_p2 = pnand %p1132_p0, %p108_p1 }
   0x5   : > { %p125_p3 = scmp.lt.s32.totalorder (!%p109_p2), %s1528_s10, 1  ;;  %p1134_p4 = scmp.ne.s32.totalorder (!%p109_p2), %s1528_s10, 0 }
   0x6   : > { %112 = sbr.rel (%p109_p2) target bundleno = 352 (0x160), region = 28 }
   0xd   : > { %s126_s11 = scalar_select %p125_p3, %s1528_s10, 1 }
   0xe   : > { %134 = sbr.rel (%p1134_p4) target bundleno = 21 (0x15), region = 32  ;;  %v1505_v0 = vmov (!%p1134_p4), 0.0  }
   0xf   : > { %s1450_s12 = smul.u32 576, %s126_s11  ;;  %135 = vst [vmem:[#allocation2] sm:$0x3] (!%p1134_p4), %v1505_v0 }
  0x11   : > { %s1537_s15 = scalar_lea.vmem %s1740_s0, %s1450_s12 }
  0x15 PF: > { %v1143_v1 = vld [vmem:[%s1741_s1 + $0x2] sm:$0x3]  ;;  %vm177_vm0 = vcmask 1041408   ;;  %v1546_v2 = vld [vmem:[%s1741_s1 + $0x8] sm:$0x3]  ;;  %v1135_v3 = vld [vmem:[%s1537_s15 + $0x90] sm:$0xff] }
  0x16   : > { %1440 = vmatprep.subr.msk.bf16.mxu1 %vm177_vm0, %v1143_v1  ;;  %1444 = vmatprep.subr.msk.bf16.mxu0 %vm177_vm0, %v1546_v2  ;;  %v179_v4 = vsel %vm177_vm0, %v1143_v1, 0  ;;  %v1555_v5 = vsel %vm177_vm0, %v1546_v2, 0  ;;  %v1558_v6 = vld [vmem:[%s1537_s15 + $0xa0] sm:$0xff]  ;;  %vm164_vm1 = vcmask 31744   ;;  %v1170_v7 = vld [vmem:[%s1537_s15 + $0x1b0] sm:$0xff]  ;;  %vm1079_vm2 = vcmask 1040384  }
  0x17   : > { %v1171_v8 = vld [vmem:[%s1537_s15 + $0x1c0] sm:$0xff]  ;;  %1285 = vmatpush3.bf16.msra.mxu1 %v179_v4  ;;  %1325 = vmatpush3.bf16.msra.mxu0 %v1555_v5  ;;  %v158_v9 = vpack.c.bf16 %v1558_v6, %v1135_v3  ;;  %v1565_v11 = vld [vmem:[%s1537_s15 + $0xb0] sm:$0xff]  ;;  %v1191_v17 = vld [vmem:[%s1741_s1 + $0xa] sm:$0x3]  ;;  %s1506_s6 = smov [#allocation2]   ;;  %p1455_p5 = scmp.eq.s32.totalorder %s1528_s10, 1 }
  0x18   : > { %v540_v10 = vpack.c.bf16 %v1171_v8, %v1170_v7  ;;  %v1568_v12 = vld [vmem:[%s1537_s15 + $0xc0] sm:$0xff]  ;;  %v1172_v15 = vld [vmem:[%s1537_s15 + $0x1d0] sm:$0xff]  ;;  %v661_v20 = vsel %vm177_vm0, %v1191_v17, 0  ;;  %1446 = vmatprep.subr.msk.bf16.mxu0 %vm177_vm0, %v1191_v17  ;;  %v1204_v29 = vld [vmem:[%s1741_s1 + $0xc] sm:$0x3]  ;;  %v848_v17 = vpack.c.bf16 %v1565_v11, %v1558_v6  ;;  %s1090_s7 = sshll.u32 %s1506_s6, 4  ;;  %s1091_s7 = int_to_ptr.vmem [resolvable:$true] %s1090_s7 }
  0x19   : > { %v148_v13 = vld [vmem:[%s1741_s1] sm:$0x3]  ;;  %v159_v14 = vpack.c.bf16 %v1568_v12, %v1565_v11  ;;  %1286 = vmatprep.mubr.msk.bf16.mxu1 %vm164_vm1, %v158_v9  ;;  %v1586_v21 = vld [vmem:[%s1537_s15 + $0xd0] sm:$0xff]  ;;  %v1152_v32 = vld [vmem:[%s1741_s1 + $0x4] sm:$0x3]  ;;  %v764_v45 = vsel %vm177_vm0, %v1204_v29, 0  ;;  %p1474_p9 = scmp.lt.s32.totalorder %s1091_s7, %s1091_s7 }
  0x1a   : > { %1441 = vmatprep.subr.msk.bf16.mxu1 %vm177_vm0, %v148_v13  ;;  %v1173_v16 = vld [vmem:[%s1537_s15 + $0x1e0] sm:$0xff]  ;;  %v259_v18 = vsel %vm177_vm0, %v148_v13, 0  ;;  %1326 = vmatprep.mubr.msk.bf16.mxu0 %vm164_vm1, %v540_v10  ;;  %v1184_v25 = vld [vmem:[%s1537_s15 + $0x131] sm:$0xff]  ;;  %v1217_v47 = vld [vmem:[%s1741_s1 + $0xe] sm:$0x3]  ;;  %v353_v49 = vsel %vm177_vm0, %v1152_v32, 0 }
  0x1b   : > { %v541_v19 = vpack.c.bf16 %v1173_v16, %v1172_v15  ;;  %v1589_v22 = vld [vmem:[%s1537_s15 + $0xe0] sm:$0xff]  ;;  %1287 = vmatmul.mubr.msk.bf16.vlgmr.msra.gmra.mrb[0].mxu1 %vm164_vm1, %v159_v14  ;;  %v1599_v26 = vld [vmem:[%s1537_s15 + $0xf0] sm:$0xff]  ;;  %v867_v4 = vsel %vm177_vm0, %v1217_v47, 0  ;;  %s1467_s8 = scalar_lea.vmem %s1091_s7, 32 }
  0x1c   : > { %v160_v23 = vpack.c.bf16 %v1589_v22, %v1586_v21  ;;  %v1183_v24 = vld [vmem:[%s1537_s15 + $0x121] sm:$0xff]  ;;  %1295 = vmatpush3.bf16.msra.mxu1 %v259_v18  ;;  %v137_v31 = vld [vmem:[%s1537_s15 + $0x10] sm:$0xff]  ;;  %p1468_p6 = scmp.ne.s32.totalorder %s1091_s7, %s1467_s8  ;;  %p1475_p10 = scmp.lt.s32.totalorder %s1467_s8, %s1467_s8 }
  0x1d   : > { %1327 = vmatmul.mubr.msk.bf16.vlgmr.msra.gmra.mrb[0].mxu0 %vm164_vm1, %v541_v19  ;;  %v1602_v27 = vld [vmem:[%s1537_s15 + $0x100] sm:$0xff]  ;;  %v642_v28 = vpack.c.bf16 %v1184_v25, %v1183_v24  ;;  %1442 = vmatprep.subr.msk.bf16.mxu1 %vm177_vm0, %v1152_v32  ;;  %v1186_v36 = vld [vmem:[%s1537_s15 + $0x151] sm:$0xff]  ;;  %v849_v24 = vpack.c.bf16 %v1586_v21, %v1568_v12 }
  0x1e   : > { %1335 = vmatpush3.bf16.msra.mxu0 %v661_v20  ;;  %1290 = vmatprep.mubr.msk.bf16.mxu1 %vm164_vm1, %v160_v23  ;;  %v136_v30 = vld [vmem:[%s1537_s15] sm:$0xff]  ;;  %v161_v33 = vpack.c.bf16 %v1602_v27, %v1599_v26  ;;  %v1188_v38 = vld [vmem:[%s1537_s15 + $0x171] sm:$0xff]  ;;  %p1469_p7 = pnand %p1468_p6, %p1455_p5  ;;  %p1476_p11 = por %p1475_p10, %p1474_p9 }
  0x1f   : > { %1336 = vmatprep.mubr.msk.bf16.mxu0 %vm164_vm1, %v642_v28  ;;  %1447 = vmatprep.subr.msk.bf16.mxu0 %vm177_vm0, %v1204_v29  ;;  %v144_v34 = vpack.c.bf16 %v137_v31, %v136_v30  ;;  %v1185_v35 = vld [vmem:[%s1537_s15 + $0x141] sm:$0xff]  ;;  %v139_v41 = vld [vmem:[%s1537_s15 + $0x30] sm:$0xff] }
  0x20   : > { %v1187_v37 = vld [vmem:[%s1537_s15 + $0x161] sm:$0xff]  ;;  %v643_v39 = vpack.c.bf16 %v1186_v36, %v1185_v35  ;;  %v141_v44 = vld [vmem:[%s1537_s15 + $0x50] sm:$0xff]  ;;  %p1470_p8 = pneg %p1469_p7 }
  0x21   : > { %v138_v40 = vld [vmem:[%s1537_s15 + $0x20] sm:$0xff]  ;;  %v644_v42 = vpack.c.bf16 %v1188_v38, %v1187_v37  ;;  %v1190_v51 = vld [vmem:[%s1537_s15 + $0x191] sm:$0xff] }
  0x22   : > { %v140_v43 = vld [vmem:[%s1537_s15 + $0x40] sm:$0xff]  ;;  %v145_v46 = vpack.c.bf16 %v139_v41, %v138_v40  ;;  %v143_v55 = vld [vmem:[%s1537_s15 + $0x70] sm:$0xff]  ;;  %v745_v56 = vpack.c.bf16 %v138_v40, %v137_v31  ;;  %p1477_p12 = pnand %p1476_p11, %p1470_p8 }
  0x23   : > { %1291 = vmatmul.mubr.msk.bf16.gmra.mrb[4].mxu1 %vm164_vm1, %v161_v33  ;;  %v146_v48 = vpack.c.bf16 %v141_v44, %v140_v43  ;;  %v1189_v50 = vld [vmem:[%s1537_s15 + $0x181] sm:$0xff]  ;;  %v1647_v58 = vld [vmem:[%s1537_s15 + $0x11] sm:$0xff]  ;;  %v746_v61 = vpack.c.bf16 %v140_v43, %v139_v41 }
  0x24   : > { %1296 = vmatprep.mubr.msk.bf16.mxu1 %vm164_vm1, %v144_v34  ;;  %v1165_v52 = vld [vmem:[%s1741_s1 + $0x6] sm:$0x3]  ;;  %v645_v53 = vpack.c.bf16 %v1190_v51, %v1189_v50  ;;  %v329_v63 = vld [vmem:[%s1537_s15 + $0x31] sm:$0xff] }
  0x25   : > { %v142_v54 = vld [vmem:[%s1537_s15 + $0x60] sm:$0xff]  ;;  %v331_v3 = vld [vmem:[%s1537_s15 + $0x51] sm:$0xff]  ;;  %v456_v10 = vsel %vm177_vm0, %v1165_v52, 0 }
  0x26   : > { %v326_v57 = vld [vmem:[%s1537_s15 + $0x1] sm:$0xff]  ;;  %v147_v59 = vpack.c.bf16 %v143_v55, %v142_v54  ;;  %v747_v0 = vpack.c.bf16 %v142_v54, %v141_v44  ;;  %v1230_v8 = vld [vmem:[%s1741_s1 + $0x10] sm:$0x3] }
  0x27   : > { %v334_v60 = vpack.c.bf16 %v1647_v58, %v326_v57  ;;  %v328_v62 = vld [vmem:[%s1537_s15 + $0x21] sm:$0xff]  ;;  %v333_v16 = vld [vmem:[%s1537_s15 + $0x71] sm:$0xff]  ;;  %v969_v29 = vsel %vm177_vm0, %v1230_v8, 0 }
  0x28   : > { %v330_v1 = vld [vmem:[%s1537_s15 + $0x41] sm:$0xff]  ;;  %v335_v7 = vpack.c.bf16 %v329_v63, %v328_v62  ;;  %v1158_v19 = vld [vmem:[%s1537_s15 + $0x130] sm:$0xff]  ;;  %v950_v32 = vpack.c.bf16 %v328_v62, %v1647_v58 }
  0x29   : > { %1337 = vmatmul.mubr.msk.bf16.vlgmr.msra.gmra.mrb[0].mxu0 %vm164_vm1, %v643_v39  ;;  %v336_v9 = vpack.c.bf16 %v331_v3, %v330_v1  ;;  %v1203_v13 = vld [vmem:[%s1537_s15 + $0x80] sm:$0xff]  ;;  %v1160_v11 = vld [vmem:[%s1537_s15 + $0x150] sm:$0xff] }
  0x2a   : > { %1345 = vmatpush3.bf16.msra.mxu0 %v764_v45  ;;  %1340 = vmatprep.mubr.msk.bf16.mxu0 %vm164_vm1, %v644_v42  ;;  %v748_v14 = vpack.c.bf16 %v1203_v13, %v143_v55  ;;  %v332_v15 = vld [vmem:[%s1537_s15 + $0x61] sm:$0xff]  ;;  %v1162_v28 = vld [vmem:[%s1537_s15 + $0x170] sm:$0xff] }
  0x2b   : > { %1448 = vmatprep.subr.msk.bf16.mxu0 %vm177_vm0, %v1217_v47  ;;  %1297 = vmatmul.mubr.msk.bf16.vlgmr.msra.gmra.mrb[0].mxu1 %vm164_vm1, %v145_v46  ;;  %v1157_v18 = vld [vmem:[%s1537_s15 + $0x120] sm:$0xff]  ;;  %v337_v20 = vpack.c.bf16 %v333_v16, %v332_v15  ;;  %v1216_v12 = vld [vmem:[%s1537_s15 + $0x110] sm:$0xff] }
  0x2c   : > { %1305 = vmatpush3.bf16.msra.mxu1 %v353_v49  ;;  %1300 = vmatprep.mubr.msk.bf16.mxu1 %vm164_vm1, %v146_v48  ;;  %v437_v23 = vpack.c.bf16 %v1158_v19, %v1157_v18  ;;  %v1159_v6 = vld [vmem:[%s1537_s15 + $0x140] sm:$0xff]  ;;  %v851_v21 = vpack.c.bf16 %v1216_v12, %v1602_v27  ;;  %v1174_v33 = vld [vmem:[%s1537_s15 + $0x1f0] sm:$0xff]  ;;  %v952_v27 = vpack.c.bf16 %v332_v15, %v331_v3 }
  0x2d   : > { %1443 = vmatprep.subr.msk.bf16.mxu1 %vm177_vm0, %v1165_v52  ;;  %v1161_v25 = vld [vmem:[%s1537_s15 + $0x160] sm:$0xff]  ;;  %v438_v30 = vpack.c.bf16 %v1160_v11, %v1159_v6  ;;  %v1176_v37 = vld [vmem:[%s1537_s15 + $0x210] sm:$0xff] }
  0x2e   : > { %v439_v31 = vpack.c.bf16 %v1162_v28, %v1161_v25  ;;  %v1175_v34 = vld [vmem:[%s1537_s15 + $0x200] sm:$0xff] }
  0x2f   : > { %v542_v36 = vpack.c.bf16 %v1175_v34, %v1174_v33  ;;  %v1177_v38 = vld [vmem:[%s1537_s15 + $0x220] sm:$0xff] }
  0x30   : > { %v1229_v39 = vld [vmem:[%s1537_s15 + $0x81] sm:$0xff]  ;;  %v543_v40 = vpack.c.bf16 %v1177_v38, %v1176_v37 }
  0x31   : > { %1341 = vmatmul.mubr.msk.bf16.gmra.mrb[4].mxu0 %vm164_vm1, %v645_v53  ;;  %v953_v41 = vpack.c.bf16 %v1229_v39, %v333_v16 }
  0x32   : > { %1346 = vmatprep.mubr.msk.bf16.mxu0 %vm164_vm1, %v745_v56 }
  0x33   : > { %1301 = vmatmul.mubr.msk.bf16.gmra.mrb[4].mxu1 %vm164_vm1, %v147_v59 }
  0x34   : > { %1306 = vmatprep.mubr.msk.bf16.mxu1 %vm164_vm1, %v334_v60 }
  0x39   : > { %1347 = vmatmul.mubr.msk.bf16.vlgmr.msra.gmra.mrb[0].mxu0 %vm164_vm1, %v746_v61 }
  0x3a   : > { %1355 = vmatpush3.bf16.msra.mxu0 %v867_v4  ;;  %1350 = vmatprep.mubr.msk.bf16.mxu0 %vm164_vm1, %v747_v0 }
  0x3b   : > { %1449 = vmatprep.subr.msk.bf16.mxu0 %vm177_vm0, %v1230_v8  ;;  %1307 = vmatmul.mubr.msk.bf16.vlgmr.msra.gmra.mrb[0].mxu1 %vm164_vm1, %v335_v7 }
  0x3c   : > { %1315 = vmatpush3.bf16.msra.mxu1 %v456_v10  ;;  %1310 = vmatprep.mubr.msk.bf16.mxu1 %vm164_vm1, %v336_v9 }
  0x3d   : > { %1445 = vmatprep.subr.msk.bf16.mxu1 %vm177_vm0, %v1546_v2  ;;  %v850_v2 = vpack.c.bf16 %v1599_v26, %v1589_v22  ;;  %v1163_v22 = vld [vmem:[%s1537_s15 + $0x180] sm:$0xff]  ;;  %v1164_v26 = vld [vmem:[%s1537_s15 + $0x190] sm:$0xff] }
  0x3e   : > { %v440_v35 = vpack.c.bf16 %v1164_v26, %v1163_v22 }
  0x41   : > { %1351 = vmatmul.mubr.msk.bf16.gmra.mrb[4].mxu0 %vm164_vm1, %v748_v14 }
  0x42   : > { %1356 = vmatprep.mubr.msk.bf16.mxu0 %vm164_vm1, %v848_v17 }
  0x43   : > { %1311 = vmatmul.mubr.msk.bf16.gmra.mrb[4].mxu1 %vm164_vm1, %v337_v20 }
  0x44   : > { %1316 = vmatprep.mubr.msk.bf16.mxu1 %vm164_vm1, %v437_v23 }
  0x49   : > { %1357 = vmatmul.mubr.msk.bf16.vlgmr.msra.gmra.mrb[0].mxu0 %vm164_vm1, %v849_v24 }
  0x4a   : > { %1365 = vmatpush3.bf16.msra.mxu0 %v969_v29  ;;  %1360 = vmatprep.mubr.msk.bf16.mxu0 %vm164_vm1, %v850_v2 }
  0x4b   : > { %1317 = vmatmul.mubr.msk.bf16.vlgmr.msra.gmra.mrb[0].mxu1 %vm164_vm1, %v438_v30 }
  0x4c   : > { %1375 = vmatpush3.bf16.msra.mxu1 %v1555_v5  ;;  %1320 = vmatprep.mubr.msk.bf16.mxu1 %vm164_vm1, %v439_v31  ;;  %v951_v5 = vpack.c.bf16 %v330_v1, %v329_v63 }
  0x51   : > { %1361 = vmatmul.mubr.msk.bf16.gmra.mrb[4].mxu0 %vm164_vm1, %v851_v21 }
  0x52   : > { %1366 = vmatprep.mubr.msk.bf16.mxu0 %vm164_vm1, %v950_v32 }
  0x53   : > { %1321 = vmatmul.mubr.msk.bf16.gmra.mrb[4].mxu1 %vm164_vm1, %v440_v35 }
  0x54   : > { %1330 = vmatprep.mubr.msk.bf16.mxu1 %vm164_vm1, %v542_v36 }
  0x59   : > { %1367 = vmatmul.mubr.msk.bf16.vlgmr.msra.gmra.mrb[0].mxu0 %vm164_vm1, %v951_v5 }
  0x5a   : > { %1370 = vmatprep.mubr.msk.bf16.mxu0 %vm164_vm1, %v952_v27  ;;  %v1078_v27 = vld [vmem:[#allocation2] sm:$0x3] }
  0x5f   : > { %1331 = vmatmul.mubr.msk.bf16.vlgmr.msra.gmra.mrb[4].mxu1 %vm164_vm1, %v543_v40 }
  0x61   : > { %1371 = vmatmul.mubr.msk.bf16.gmra.mrb[4].mxu0 %vm164_vm1, %v953_v41 }
 0x11e   : > { %v1318_v42 = vpop.f32.mrb[0].mxu1 }
 0x11f   : > { %v492_v43 = vpop.f32.mrb[1].mxu1 }
 0x120   : > { %v1319_v44 = vpop.f32.mrb[2].mxu1 }
 0x121   : > { %v495_v45 = vpop.f32.mrb[3].mxu1 }
 0x12c   : > { %v1368_v46 = vpop.f32.mrb[0].mxu0 }
 0x12d   : > { %v1376_v47 = vadd.f32 %v1368_v46, %v1318_v42  ;;  %v1005_v48 = vpop.f32.mrb[1].mxu0 }
 0x12e   : > { %v1377_v49 = vadd.f32 %v1005_v48, %v492_v43  ;;  %v1369_v50 = vpop.f32.mrb[2].mxu0 }
 0x12f   : > { %v1378_v51 = vadd.f32 %v1369_v50, %v1319_v44  ;;  %v1008_v52 = vpop.f32.mrb[3].mxu0  ;;  %v1059_v58 = vmul.f32 %v1376_v47, %v1376_v47 }
 0x130   : > { %v1379_v53 = vadd.f32 %v1008_v52, %v495_v45  ;;  %v1057_v54 = vmul.f32 %v1377_v49, %v1377_v49 }
 0x131   : > { %v1060_v3 = vmul.f32 %v1378_v51, %v1378_v51 }
 0x132   : > { %v1044_v55 = vadd.f32 %v1379_v53, %v1377_v49  ;;  %v1058_v56 = vmul.f32 %v1379_v53, %v1379_v53  ;;  %v1332_v57 = vpop.f32.mrb[4].mxu1 }
 0x133   : > { %v611_v62 = vpop.f32.mrb[5].mxu1 }
 0x134   : > { %v1045_v59 = vadd.f32 %v1376_v47, %v1044_v55  ;;  %v1065_v60 = vadd.f32 %v1058_v56, %v1057_v54  ;;  %v1372_v61 = vpop.f32.mrb[4].mxu0  ;;  %v1333_v1 = vpop.f32.mrb[6].mxu1 }
 0x135   : > { %v1380_v63 = vadd.f32 %v1372_v61, %v1332_v57  ;;  %v1021_v0 = vpop.f32.mrb[5].mxu0  ;;  %v614_v10 = vpop.f32.mrb[7].mxu1 }
 0x136   : > { %v1066_v4 = vadd.f32 %v1065_v60, %v1059_v58  ;;  %v1381_v7 = vadd.f32 %v1021_v0, %v611_v62  ;;  %v1046_v8 = vadd.f32 %v1378_v51, %v1045_v59  ;;  %v1373_v9 = vpop.f32.mrb[6].mxu0 }
 0x137   : > { %v1382_v13 = vadd.f32 %v1373_v9, %v1333_v1  ;;  %v1024_v14 = vpop.f32.mrb[7].mxu0  ;;  %v1063_v24 = vmul.f32 %v1380_v63, %v1380_v63 }
 0x138   : > { %v1047_v15 = vadd.f32 %v1381_v7, %v1046_v8  ;;  %v1061_v16 = vmul.f32 %v1381_v7, %v1381_v7  ;;  %v1067_v17 = vadd.f32 %v1066_v4, %v1060_v3  ;;  %v1383_v18 = vadd.f32 %v1024_v14, %v614_v10 }
 0x139   : > { %v1064_v2 = vmul.f32 %v1382_v13, %v1382_v13 }
 0x13a   : > { %v1068_v19 = vadd.f32 %v1067_v17, %v1061_v16  ;;  %v1048_v20 = vadd.f32 %v1383_v18, %v1047_v15  ;;  %v1062_v23 = vmul.f32 %v1383_v18, %v1383_v18 }
 0x13c   : > { %v1049_v6 = vadd.f32 %v1380_v63, %v1048_v20  ;;  %v1069_v11 = vadd.f32 %v1068_v19, %v1062_v23 }
 0x13e   : > { %v1050_v25 = vadd.f32 %v1382_v13, %v1049_v6  ;;  %v1070_v28 = vadd.f32 %v1069_v11, %v1063_v24 }
 0x140   : > { %v1051_v29 = vrot.slane %v1050_v25, 4  ;;  %v1071_v30 = vadd.f32 %v1070_v28, %v1064_v2 }
 0x142   : > { %v1052_v31 = vadd.f32 %v1051_v29, %v1050_v25  ;;  %v1072_v12 = vrot.slane %v1071_v30, 4 }
 0x144   : > { %v1053_v21 = vrot.slane %v1052_v31, 2  ;;  %v1073_v22 = vadd.f32 %v1072_v12, %v1071_v30 }
 0x146   : > { %v1054_v26 = vadd.f32 %v1053_v21, %v1052_v31  ;;  %v1074_v32 = vrot.slane %v1073_v22, 2 }
 0x148   : > { %v1055_v33 = vrot.slane %v1054_v26, 1  ;;  %v1075_v34 = vadd.f32 %v1074_v32, %v1073_v22 }
 0x14a   : > { %v1076_v35 = vrot.slane %v1075_v34, 1  ;;  %v1056_v36 = vadd.f32 %v1055_v33, %v1054_v26 }
 0x14c   : > { %v1077_v5 = vadd.f32 %v1076_v35, %v1075_v34 }
 0x14e   : > { %v1080_v37 = vsel %vm1079_vm2, %v1056_v36, %v1077_v5 }
 0x14f   : > { %v1081_v38 = vadd.f32 %v1080_v37, %v1078_v27 }
 0x151   : > { %1082 = vst [vmem:[#allocation2] sm:$0x3] %v1081_v38 }
 0x152   : > { %1480 = shalt.err (!%p1477_p12)
}
 0x153   : > { %s1481_s13 = scalar_lea.hbm %s1742_s2, 32 }
 0x154   : > { %p1482_p13 = scmp.ne.s32.totalorder %s1742_s2, %s1481_s13  ;;  %p1487_p2 = scmp.lt.u32.totalorder %s1481_s13, %s1742_s2 }
 0x156   : > { %p1483_p0 = pnand %p1482_p13, %p1455_p5 }
 0x158   : > { %p1484_p1 = pneg %p1483_p0 }
 0x15a   : > { %p1489_p3 = pnand %p1487_p2, %p1484_p1 }
 0x15c   : > { %1492 = shalt.err (!%p1489_p3)
}
 0x15d   : > { %1452 = dma.vmem_to_hbm [thread:$0]  (%p1455_p5), %s1091_s7, 32, %s1742_s2, [#allocation3]  }
 0x15e   : > { %1498 = dma.done.wait (%p1455_p5), [#allocation3], 32  }
 0x15f   : > { %1500 = vsyncadd (%p1455_p5), [#allocation3], 4294967264 }
 0x160 PF: > { %s13_s9 = sadd.s32 1, %s1503_s9  }
 0x161   : > { %p10_p4 = scmp.ge.s32.totalorder %s13_s9, 4  }
 0x163   :  { %12 = sbr.rel (!%p10_p4) target bundleno = 1 (0x1), region = 72 }
 0x16a   :  { %1103 = vsyncpa [#allocation3], 1 }
 0x16b   :  { %1105 = vsyncpa [#allocation3 + $0x1], 1 }

</bundles_post_ra>
